<compile_context>
chip_gen: v7x
topology: tpu7x:2x2x1
jax: 0.10.0
libtpu: 0.0.40
codegen_flags: <defaults>
</compile_context>

<pallas_src>
import functools

import jax
import jax.numpy as jnp
from jax.experimental import pallas as pl
from jax.experimental.pallas import tpu as pltpu

HEAD_DIM = 16


# ----------------------------------------------------------------------------
# Kernel bodies
# ----------------------------------------------------------------------------
def _project_heads(x, w_h):
    """x: (M, E), w_h: (H, E, Dout) -> (H, M, Dout) f32.

    Head-batched projection: the single VMEM activation block is broadcast over
    the (small) head axis in-register, so the activation is DMA'd once and the
    result is already head-major (no 16-lane per-head slicing afterwards).
    """
    num_heads = w_h.shape[0]
    xb = jnp.broadcast_to(x, (num_heads,) + x.shape)          # (H, M, E)
    return jnp.einsum('hme,hed->hmd', xb, w_h,
                      preferred_element_type=jnp.float32)


def _attention_core(qh, kh, vh, wo_h, *, bblk, nodes_q, nodes_kv, operand_dtype):
    """qh/kh/vh: (H, M*, 16) f32 head-major projections (Q pre-scaled via Wq).

    Heads and batch elements are fused into one leading batch axis so every
    matmul is a single 3-D batched contraction.  MXU operands are cast to
    `operand_dtype` (bf16 by default); accumulation stays f32.
    """
    H, Mq, D = qh.shape
    Z = H * bblk
    # Leading/second-minor reshapes only (M* = bblk * nodes); done on f32 data,
    # cast afterwards so bf16 sublane packing never constrains the reshape.
    qz = qh.reshape(Z, nodes_q, D).astype(operand_dtype)
    kz = kh.reshape(Z, nodes_kv, D).astype(operand_dtype)
    vz = vh.reshape(Z, nodes_kv, D).astype(operand_dtype)

    u = jnp.einsum('znd,zmd->znm', qz, kz,
                   preferred_element_type=jnp.float32)         # (Z, Nq, Nkv)
    # TODO(synk): `clip` (clip*tanh) and `mask` (-inf fill) hooks go here.
    u = u - jnp.max(u, axis=-1, keepdims=True)
    e = jnp.exp(u)
    p = e * pl.reciprocal(jnp.sum(e, axis=-1, keepdims=True), approx=True)

    ctx = jnp.einsum('znm,zmd->znd', p.astype(operand_dtype), vz,
                     preferred_element_type=jnp.float32)       # (Z, Nq, D)

    # Output projection folded per head then reduced over heads (equivalent to
    # concat-over-heads @ W_out, without the lane-narrow concat).
    ctx_h = ctx.reshape(H, Mq, D).astype(operand_dtype)
    out_h = jnp.einsum('hmd,hde->hme', ctx_h, wo_h.astype(operand_dtype),
                       preferred_element_type=jnp.float32)     # (H, Mq, Ev)
    return jnp.sum(out_h, axis=0)                              # (Mq, Ev)


def _mha_self_kernel(x_ref, wqkv_ref, wo_ref, o_ref, *,
                     num_heads, num_nodes, operand_dtype):
    """Self-attention fast path: one activation block, fused QKV projection."""
    D = HEAD_DIM
    M = x_ref.shape[0]
    bblk = M // num_nodes
    qkv = _project_heads(x_ref[...], wqkv_ref[...])            # (H, M, 3*D) f32
    qh = qkv[:, :, 0:D]
    kh = qkv[:, :, D:2 * D]
    vh = qkv[:, :, 2 * D:3 * D]
    out = _attention_core(qh, kh, vh, wo_ref[...], bblk=bblk,
                          nodes_q=num_nodes, nodes_kv=num_nodes,
                          operand_dtype=operand_dtype)
    o_ref[...] = out.astype(o_ref.dtype)


def _mha_cross_kernel(q_ref, k_ref, v_ref, wq_ref, wk_ref, wv_ref, wo_ref, o_ref,
                      *, num_heads, nodes_q, nodes_kv, operand_dtype):
    """General path (distinct Q, K, V inputs)."""
    bblk = q_ref.shape[0] // nodes_q
    qh = _project_heads(q_ref[...], wq_ref[...])               # scale folded in Wq
    kh = _project_heads(k_ref[...], wk_ref[...])
    vh = _project_heads(v_ref[...], wv_ref[...])
    out = _attention_core(qh, kh, vh, wo_ref[...], bblk=bblk,
                          nodes_q=nodes_q, nodes_kv=nodes_kv,
                          operand_dtype=operand_dtype)
    o_ref[...] = out.astype(o_ref.dtype)


# ----------------------------------------------------------------------------
# Wrapper-side tiling / cost helpers
# ----------------------------------------------------------------------------
def _dual_tensorcore_chip():
    """Best-effort: v7x has 2 TensorCores per chip -> prefer >=2 grid steps."""
    try:
        kind = jax.devices()[0].device_kind.lower()
    except Exception:
        return False
    return "v7" in kind or "tpu7" in kind


def _pick_batch_block(batch, nodes_list, dtype, *, target_rows=1024, min_rows=128):
    """How many whole batch elements go into one grid step."""
    itemsize = int(jnp.dtype(dtype).itemsize)
    # Sublane packing: f32 -> 8 rows, bf16 -> 16, int8/fp8 -> 32.
    sublane_mult = max(8, 32 // max(itemsize, 1))

    def ok(d):
        return d == batch or all((d * n) % sublane_mult == 0 for n in nodes_list)

    nmax = max(nodes_list)
    divisors = [d for d in range(1, batch + 1) if batch % d == 0]
    fitting = [d for d in divisors if ok(d) and d * nmax <= max(target_rows, nmax)]
    if not fitting:
        return batch                         # full extent always lowers
    bblk = max(fitting)
    if _dual_tensorcore_chip() and batch > 1:
        halves = [d for d in fitting if d <= batch // 2]
        if halves:                           # keep both TCs busy on v7x
            return max(halves)
    if bblk == batch and batch > 1:
        # Single-TC chips: only split when each step still has plenty of rows.
        smaller = [d for d in fitting
                   if d < batch and d * min(nodes_list) >= min_rows]
        if smaller:
            return max(smaller)
    return bblk


def _cost_estimate(B, Nq, Nkv, Eq, Ek, Evv, hid, Ev_out, H, itemsize, shared_qkv):
    D = HEAD_DIM
    flops = (2 * B * Nq * Eq * hid             # Q projection
             + 2 * B * Nkv * Ek * hid          # K projection
             + 2 * B * Nkv * Evv * hid         # V projection
             + 4 * B * H * Nq * Nkv * D        # QK^T + PV
             + 2 * B * Nq * hid * Ev_out)      # output projection
    transcendentals = B * H * Nq * Nkv
    act = B * Nq * (Eq + Ev_out) + (0 if shared_qkv else B * Nkv * (Ek + Evv))
    wts = H * D * (Eq + Ek + Evv) + hid * Ev_out
    return pl.CostEstimate(flops=int(flops),
                           transcendentals=int(transcendentals),
                           bytes_accessed=int(itemsize * (act + wts)))


def _vmem_limit_bytes(Mq, Mkv, Eq, Ek, Evv, hid, Ev_out, H, bblk, Nq, Nkv,
                      itemsize, shared_qkv):
    D = HEAD_DIM
    io_blocks = 2 * (Mq * Eq + Mq * Ev_out
                     + (0 if shared_qkv else Mkv * (Ek + Evv))) * itemsize
    w_blocks = 2 * (H * D * (Eq + Ek + Evv) + hid * Ev_out) * itemsize
    inter = 4 * (3 * H * max(Mq, Mkv) * D        # head-major projections (f32)
                 + H * bblk * Nq * Nkv           # scores
                 + H * Mq * D                    # ctx
                 + H * Mq * Ev_out)              # per-head out before reduce
    est = io_blocks + w_blocks + inter
    # Cap at 64 MiB so the limit is valid on v7x as well; floor at 32 MiB.
    return int(min(64 * 1024 * 1024, max(32 * 1024 * 1024, 4 * est)))


# ----------------------------------------------------------------------------
# Public wrapper
# ----------------------------------------------------------------------------
def multi_head_attention(Q, K=None, V=None, *, wq, wk, wv, wo, num_heads,
                         operand_dtype=jnp.bfloat16):
    """Forward of MultiHeadAttention.

    Q: (B, Nq, Eq).  K, V: (B, Nkv, E*) or both None (self-attention, as in the
    PyTorch forward).  wq/wk/wv: (E*, 16*H) already transposed to (in, out);
    wo: (16*H, Ev_out).  `operand_dtype` is the dtype fed to the MXU for the
    attention / output-projection matmuls (accumulation is always f32).
    """
    if (K is None) != (V is None):
        raise ValueError("pass both K and V, or neither")
    self_attn = K is None or (K is Q and V is Q)

    B, Nq, Eq = Q.shape
    H, D = num_heads, HEAD_DIM
    hid = H * D
    Ev_out = wo.shape[-1]

    def to_heads(w):                                   # (E, H*D) -> (H, E, D)
        return jnp.transpose(w.reshape(w.shape[0], H, D), (1, 0, 2))

    # Fold the 1/sqrt(16) logit scale into the Q projection weight (one-time).
    wq_h = to_heads(wq * (1.0 / (D ** 0.5)))
    wk_h = to_heads(wk)
    wv_h = to_heads(wv)
    wo_h = wo.reshape(H, D, Ev_out)                    # (H, D, Ev)

    if self_attn:
        Nkv, Ek, Evv = Nq, Eq, Eq
    else:
        _, Nkv, Ek = K.shape
        Evv = V.shape[-1]
        if K.shape[0] != B or V.shape[0] != B or V.shape[1] != Nkv:
            raise ValueError("batch / node mismatch between Q, K, V")

    bblk = _pick_batch_block(B, (Nq, Nkv), Q.dtype)
    grid = (B // bblk,)
    Mq, Mkv = bblk * Nq, bblk * Nkv
    itemsize = int(jnp.dtype(Q.dtype).itemsize)

    cost = _cost_estimate(B, Nq, Nkv, Eq, Ek, Evv, hid, Ev_out, H, itemsize,
                          self_attn)
    compiler_params = pltpu.CompilerParams(
        dimension_semantics=("parallel",),             # disjoint output rows
        vmem_limit_bytes=_vmem_limit_bytes(Mq, Mkv, Eq, Ek, Evv, hid, Ev_out,
                                           H, bblk, Nq, Nkv, itemsize,
                                           self_attn))
    out_shape = jax.ShapeDtypeStruct((B * Nq, Ev_out), Q.dtype)
    out_spec = pl.BlockSpec((Mq, Ev_out), lambda i: (i, 0))

    if self_attn:
        # Fused W_qkv per head: (H, Eq, 3*D) — the activation is DMA'd once.
        wqkv_h = jnp.concatenate([wq_h, wk_h, wv_h], axis=-1)
        kernel = functools.partial(_mha_self_kernel, num_heads=H, num_nodes=Nq,
                                   operand_dtype=operand_dtype)
        grid_spec = pltpu.PrefetchScalarGridSpec(
            num_scalar_prefetch=0, grid=grid,
            in_specs=[
                pl.BlockSpec((Mq, Eq), lambda i: (i, 0)),            # x rows
                pl.BlockSpec((H, Eq, 3 * D), lambda i: (0, 0, 0)),   # W_qkv
                pl.BlockSpec((H, D, Ev_out), lambda i: (0, 0, 0)),   # W_out
            ],
            out_specs=out_spec)
        out2 = pl.pallas_call(kernel, out_shape=out_shape, grid_spec=grid_spec,
                              compiler_params=compiler_params,
                              cost_estimate=cost)(
            Q.reshape(B * Nq, Eq), wqkv_h, wo_h)
    else:
        kernel = functools.partial(_mha_cross_kernel, num_heads=H,
                                   nodes_q=Nq, nodes_kv=Nkv,
                                   operand_dtype=operand_dtype)
        grid_spec = pltpu.PrefetchScalarGridSpec(
            num_scalar_prefetch=0, grid=grid,
            in_specs=[
                pl.BlockSpec((Mq, Eq), lambda i: (i, 0)),
                pl.BlockSpec((Mkv, Ek), lambda i: (i, 0)),
                pl.BlockSpec((Mkv, Evv), lambda i: (i, 0)),
                pl.BlockSpec((H, Eq, D), lambda i: (0, 0, 0)),
                pl.BlockSpec((H, Ek, D), lambda i: (0, 0, 0)),
                pl.BlockSpec((H, Evv, D), lambda i: (0, 0, 0)),
                pl.BlockSpec((H, D, Ev_out), lambda i: (0, 0, 0)),
            ],
            out_specs=out_spec)
        out2 = pl.pallas_call(kernel, out_shape=out_shape, grid_spec=grid_spec,
                              compiler_params=compiler_params,
                              cost_estimate=cost)(
            Q.reshape(B * Nq, Eq), K.reshape(B * Nkv, Ek),
            V.reshape(B * Nkv, Evv), wq_h, wk_h, wv_h, wo_h)

    return out2.reshape(B, Nq, Ev_out)


# ----------------------------------------------------------------------------
# Pure-JAX reference (mirror of the PyTorch forward) + self-test
# ----------------------------------------------------------------------------
def _reference(Q, K, V, wq, wk, wv, wo, *, num_heads):
    B, Nq, _ = Q.shape
    Nkv = K.shape[1]
    qp, kp, vp = Q @ wq, K @ wk, V @ wv

    def split(x, n):  # chunk(dim=-1) + stack(dim=1)
        return x.reshape(B, n, num_heads, HEAD_DIM).transpose(0, 2, 1, 3)

    qh, kh, vh = split(qp, Nq), split(kp, Nkv), split(vp, Nkv)
    u = jnp.einsum('bhnd,bhmd->bhnm', qh, kh) / (HEAD_DIM ** 0.5)
    p = jax.nn.softmax(u, axis=-1)
    o = jnp.einsum('bhnm,bhmd->bhnd', p, vh)
    o = o.transpose(0, 2, 1, 3).reshape(B, Nq, num_heads * HEAD_DIM)
    return o @ wo


if __name__ == "__main__":
    num_heads = 2
    q_embed = 32              # k_embed = v_embed = q_embed (module defaults)
    B, N = 2, 8
    hid = HEAD_DIM * num_heads

    key = jax.random.PRNGKey(0)
    kq, kk, kv, ko, kx, kk2, kv2 = jax.random.split(key, 7)

    # nn.Linear(in, out, bias=False): weight (out, in), applied x @ W^T; build
    # W^T = (in, out) directly with the same U(-1/sqrt(in), 1/sqrt(in)) init.
    def linear_wT(k, in_f, out_f):
        bound = 1.0 / (in_f ** 0.5)
        return jax.random.uniform(k, (in_f, out_f), jnp.float32, -bound, bound)

    wq = linear_wT(kq, q_embed, hid)
    wk = linear_wT(kk, q_embed, hid)
    wv = linear_wT(kv, q_embed, hid)
    wo = linear_wT(ko, hid, q_embed)

    x = jax.random.normal(kx, (B, N, q_embed), jnp.float32)
    ref = _reference(x, x, x, wq, wk, wv, wo, num_heads=num_heads)

    # 1) Self-attention fast path (K=V=None), default bf16 MXU operands.
    out = multi_head_attention(x, wq=wq, wk=wk, wv=wv, wo=wo,
                               num_heads=num_heads)
    out = jax.block_until_ready(out)
    assert out.shape == (B, N, q_embed)
    # bf16 MXU operands (f32 accumulation) + approx reciprocal -> loose tol.
    assert jnp.allclose(out, ref, atol=2e-2, rtol=2e-2), "bf16 path mismatch"

    # 2) Same path with f32 operands: tight structural check.
    out32 = multi_head_attention(x, wq=wq, wk=wk, wv=wv, wo=wo,
                                 num_heads=num_heads,
                                 operand_dtype=jnp.float32)
    out32 = jax.block_until_ready(out32)
    assert jnp.allclose(out32, ref, atol=2e-3, rtol=2e-3), "f32 path mismatch"

    # 3) General (cross-attention) path with distinct K / V tensors.
    k_in = jax.random.normal(kk2, (B, N, q_embed), jnp.float32)
    v_in = jax.random.normal(kv2, (B, N, q_embed), jnp.float32)
    outx = multi_head_attention(x, k_in, v_in, wq=wq, wk=wk, wv=wv, wo=wo,
                                num_heads=num_heads,
                                operand_dtype=jnp.float32)
    outx = jax.block_until_ready(outx)
    refx = _reference(x, k_in, v_in, wq, wk, wv, wo, num_heads=num_heads)
    assert jnp.allclose(outx, refx, atol=2e-3, rtol=2e-3), "cross path mismatch"

    print("KERNEL_OK")
</pallas_src>

<mosaic_0001>
module attributes {stable_mosaic.version = 11 : i64} {
  func.func @_mha_self_kernel(%arg0: i32, %arg1: memref<16x32xf32, #tpu.memory_space<vmem>>, %arg2: memref<2x32x48xf32, #tpu.memory_space<vmem>>, %arg3: memref<2x16x32xf32, #tpu.memory_space<vmem>>, %arg4: memref<16x32xf32, #tpu.memory_space<vmem>>) attributes {dimension_semantics = [#tpu.dimension_semantics<parallel>], iteration_bounds = array<i64: 1>, scalar_prefetch = 0 : i64, scratch_operands = 0 : i64, tpu.core_type = #tpu.core_type<tc>, window_params = [{transform_indices = @transform_0, window_bounds = array<i64: 16, 32>}, {pipeline_mode = #tpu.pipeline_mode<synchronous>, transform_indices = @transform_1, window_bounds = array<i64: 2, 32, 48>}, {pipeline_mode = #tpu.pipeline_mode<synchronous>, transform_indices = @transform_2, window_bounds = array<i64: 2, 16, 32>}, {transform_indices = @transform_3, window_bounds = array<i64: 16, 32>}]} {
    %c0 = arith.constant 0 : index
    %c0_0 = arith.constant 0 : index
    %0 = vector.load %arg1[%c0, %c0_0] : memref<16x32xf32, #tpu.memory_space<vmem>>, vector<16x32xf32>
    %c0_1 = arith.constant 0 : index
    %c0_2 = arith.constant 0 : index
    %c0_3 = arith.constant 0 : index
    %1 = vector.load %arg2[%c0_1, %c0_2, %c0_3] : memref<2x32x48xf32, #tpu.memory_space<vmem>>, vector<2x32x48xf32>
    %2 = vector.shape_cast %0 : vector<16x32xf32> to vector<1x16x32xf32>
    %3 = vector.broadcast %2 : vector<1x16x32xf32> to vector<2x16x32xf32>
    "tpu.trace_start"() <{level = 10 : i32, message = "hme,hed->hmd"}> : () -> ()
    %cst = arith.constant dense<0.000000e+00> : vector<2x16x48xf32>
    %4 = tpu.matmul %3, %1, %cst {dimension_numbers = #tpu.dot_dimension_numbers<[2], [1], [1], [2], [0, 0, 0, 1, 1, 2], [0], [0]>} : vector<2x16x32xf32>, vector<2x32x48xf32>, vector<2x16x48xf32> -> vector<2x16x48xf32>
    "tpu.trace_stop"() : () -> ()
    %5 = vector.extract_strided_slice %4 {offsets = [0, 0, 0], sizes = [2, 16, 16], strides = [1, 1, 1]} : vector<2x16x48xf32> to vector<2x16x16xf32>
    %6 = vector.extract_strided_slice %4 {offsets = [0, 0, 16], sizes = [2, 16, 16], strides = [1, 1, 1]} : vector<2x16x48xf32> to vector<2x16x16xf32>
    %7 = vector.extract_strided_slice %4 {offsets = [0, 0, 32], sizes = [2, 16, 16], strides = [1, 1, 1]} : vector<2x16x48xf32> to vector<2x16x16xf32>
    %c0_4 = arith.constant 0 : index
    %c0_5 = arith.constant 0 : index
    %c0_6 = arith.constant 0 : index
    %8 = vector.load %arg3[%c0_4, %c0_5, %c0_6] : memref<2x16x32xf32, #tpu.memory_space<vmem>>, vector<2x16x32xf32>
    %9 = vector.shape_cast %5 : vector<2x16x16xf32> to vector<4x8x16xf32>
    %10 = arith.truncf %9 : vector<4x8x16xf32> to vector<4x8x16xbf16>
    %11 = vector.shape_cast %6 : vector<2x16x16xf32> to vector<4x8x16xf32>
    %12 = arith.truncf %11 : vector<4x8x16xf32> to vector<4x8x16xbf16>
    %13 = vector.shape_cast %7 : vector<2x16x16xf32> to vector<4x8x16xf32>
    %14 = arith.truncf %13 : vector<4x8x16xf32> to vector<4x8x16xbf16>
    "tpu.trace_start"() <{level = 10 : i32, message = "znd,zmd->znm"}> : () -> ()
    %cst_7 = arith.constant dense<0.000000e+00> : vector<4x8x8xf32>
    %15 = tpu.matmul %10, %12, %cst_7 {dimension_numbers = #tpu.dot_dimension_numbers<[2], [2], [1], [1], [0, 0, 0, 1, 1, 1], [0], [0]>} : vector<4x8x16xbf16>, vector<4x8x16xbf16>, vector<4x8x8xf32> -> vector<4x8x8xf32>
    "tpu.trace_stop"() : () -> ()
    %cst_8 = arith.constant dense<0xFF800000> : vector<4x8xf32>
    %16 = vector.multi_reduction <maximumf>, %15, %cst_8 [2] : vector<4x8x8xf32> to vector<4x8xf32>
    %17 = vector.shape_cast %16 : vector<4x8xf32> to vector<4x8x1xf32>
    %18 = vector.broadcast %17 : vector<4x8x1xf32> to vector<4x8x8xf32>
    %19 = arith.subf %15, %18 : vector<4x8x8xf32>
    %20 = math.exp %19 : vector<4x8x8xf32>
    %cst_9 = arith.constant dense<0.000000e+00> : vector<4x8xf32>
    %21 = vector.multi_reduction <add>, %20, %cst_9 [2] : vector<4x8x8xf32> to vector<4x8xf32>
    %22 = vector.shape_cast %21 : vector<4x8xf32> to vector<4x8x1xf32>
    %23 = tpu.reciprocal %22 {approx = true} : vector<4x8x1xf32> -> vector<4x8x1xf32>
    %24 = vector.broadcast %23 : vector<4x8x1xf32> to vector<4x8x8xf32>
    %25 = arith.mulf %20, %24 : vector<4x8x8xf32>
    %26 = arith.truncf %25 : vector<4x8x8xf32> to vector<4x8x8xbf16>
    "tpu.trace_start"() <{level = 10 : i32, message = "znm,zmd->znd"}> : () -> ()
    %cst_10 = arith.constant dense<0.000000e+00> : vector<4x8x16xf32>
    %27 = tpu.matmul %26, %14, %cst_10 {dimension_numbers = #tpu.dot_dimension_numbers<[2], [1], [1], [2], [0, 0, 0, 1, 1, 2], [0], [0]>} : vector<4x8x8xbf16>, vector<4x8x16xbf16>, vector<4x8x16xf32> -> vector<4x8x16xf32>
    "tpu.trace_stop"() : () -> ()
    %28 = vector.shape_cast %27 : vector<4x8x16xf32> to vector<2x16x16xf32>
    %29 = arith.truncf %28 : vector<2x16x16xf32> to vector<2x16x16xbf16>
    %30 = arith.truncf %8 : vector<2x16x32xf32> to vector<2x16x32xbf16>
    "tpu.trace_start"() <{level = 10 : i32, message = "hmd,hde->hme"}> : () -> ()
    %cst_11 = arith.constant dense<0.000000e+00> : vector<2x16x32xf32>
    %31 = tpu.matmul %29, %30, %cst_11 {dimension_numbers = #tpu.dot_dimension_numbers<[2], [1], [1], [2], [0, 0, 0, 1, 1, 2], [0], [0]>} : vector<2x16x16xbf16>, vector<2x16x32xbf16>, vector<2x16x32xf32> -> vector<2x16x32xf32>
    "tpu.trace_stop"() : () -> ()
    %cst_12 = arith.constant dense<0.000000e+00> : vector<16x32xf32>
    %32 = vector.multi_reduction <add>, %31, %cst_12 [0] : vector<2x16x32xf32> to vector<16x32xf32>
    %c0_13 = arith.constant 0 : index
    %c0_14 = arith.constant 0 : index
    %33 = vector.load %arg4[%c0_13, %c0_14] : memref<16x32xf32, #tpu.memory_space<vmem>>, vector<16x32xf32>
    tpu.vector_store %arg4[%c0_13, %c0_14], %32 {strides = array<i32>} : memref<16x32xf32, #tpu.memory_space<vmem>>, vector<16x32xf32>,
    return
  }
  func.func @transform_0(%arg0: i32) -> (i32, i32) {
    %c0_i32 = arith.constant 0 : i32
    %c0_i32_0 = arith.constant 0 : i32
    return %arg0, %c0_i32 : i32, i32
  }
  func.func @transform_1(%arg0: i32) -> (i32, i32, i32) {
    %c0_i32 = arith.constant 0 : i32
    %c0_i32_0 = arith.constant 0 : i32
    %c0_i32_1 = arith.constant 0 : i32
    %c0_i32_2 = arith.constant 0 : i32
    return %c0_i32, %c0_i32_0, %c0_i32_1 : i32, i32, i32
  }
  func.func @transform_2(%arg0: i32) -> (i32, i32, i32) {
    %c0_i32 = arith.constant 0 : i32
    %c0_i32_0 = arith.constant 0 : i32
    %c0_i32_1 = arith.constant 0 : i32
    %c0_i32_2 = arith.constant 0 : i32
    return %c0_i32, %c0_i32_0, %c0_i32_1 : i32, i32, i32
  }
  func.func @transform_3(%arg0: i32) -> (i32, i32) {
    %c0_i32 = arith.constant 0 : i32
    %c0_i32_0 = arith.constant 0 : i32
    return %arg0, %c0_i32 : i32, i32
  }
}

</mosaic_0001>

<bundles_post_ra>
// kernel: tpu_custom_call.1
= control target key start
LH: loop header
LB: loop body
LE: loop exit
PB: predicated region body
PF: predicated region fallthrough
CT: control target
= control target key end

     0   :  { %8 = vsyncpa [#allocation3], 0  ;;  %s1235_s0 = inlined_call_operand.hbm [shape: f32[16,32], index: 0, kind: input, shape index: {}]   ;;  %s1236_s1 = inlined_call_operand.hbm [shape: f32[2,32,48], index: 1, kind: input, shape index: {}]   ;;  %s1237_s2 = inlined_call_operand.hbm [shape: f32[2,16,32], index: 2, kind: input, shape index: {}]   ;;  %s1238_s3 = inlined_call_operand.hbm [shape: f32[16,32], index: 3, kind: output, shape index: {}]  }
   0x1   :  { %9 = vsyncpa [#allocation6], 0 }
   0x2   :  { %10 = vsyncpa [#allocation4], 0  ;;  %s1053_s12 = smov [#allocation5]   ;;  %s1054_s14 = smov [#allocation2]  }
   0x3   :  { %s28_s13 = sshll.u32 %s1053_s12, 4  ;;  %s16_s15 = sshll.u32 %s1054_s14, 4  ;;  %s29_s13 = int_to_ptr.vmem [resolvable:$true] %s28_s13  ;;  %s1083_s15 = int_to_ptr.vmem [resolvable:$true] %s16_s15 }
   0x4   :  { %s959_s18 = scalar_lea.hbm %s1236_s1, 1024 }
   0x5   :  { %p960_p0 = scmp.ne.s32.totalorder %s1236_s1, %s959_s18  ;;  %p963_p1 = scmp.lt.u32.totalorder %s959_s18, %s1236_s1 }
   0x7   :  { %p965_p2 = pnand %p963_p1, %p960_p0 }
   0x9   :  { %968 = shalt.err (!%p965_p2)
}
   0xa   :  { %s969_s23 = scalar_lea.vmem %s29_s13, 1024  ;;  %p974_p4 = scmp.lt.s32.totalorder %s29_s13, %s29_s13 }
   0xb   :  { %p970_p3 = scmp.ne.s32.totalorder %s29_s13, %s969_s23  ;;  %p975_p5 = scmp.lt.s32.totalorder %s969_s23, %s969_s23 }
   0xd   :  { %p976_p6 = por %p975_p5, %p974_p4 }
   0xf   :  { %p977_p7 = pnand %p976_p6, %p970_p3 }
  0x11   :  { %980 = shalt.err (!%p977_p7)
}
  0x12   :  { %s1055_s24 = smov 128   ;;  %s1056_s25 = smov 8  }
  0x13   :  { %34 = dma.hbm_to_vmem [thread:$0]  %s1236_s1, 1024, %s29_s13, [#allocation6], %s1055_s24, %s1055_s24, %s1056_s25  }
  0x14   :  { %s981_s30 = scalar_lea.hbm %s1235_s0, 256 }
  0x15   :  { %p982_p8 = scmp.ne.s32.totalorder %s1235_s0, %s981_s30  ;;  %p985_p9 = scmp.lt.u32.totalorder %s981_s30, %s1235_s0 }
  0x17   :  { %p987_p10 = pnand %p985_p9, %p982_p8 }
  0x19   :  { %990 = shalt.err (!%p987_p10)
}
  0x1a   :  { %s991_s8 = scalar_lea.vmem %s1083_s15, 256  ;;  %p996_p12 = scmp.lt.s32.totalorder %s1083_s15, %s1083_s15 }
  0x1b   :  { %p992_p11 = scmp.ne.s32.totalorder %s1083_s15, %s991_s8  ;;  %p997_p13 = scmp.lt.s32.totalorder %s991_s8, %s991_s8 }
  0x1d   :  { %p998_p0 = por %p997_p13, %p996_p12 }
  0x1f   :  { %p999_p1 = pnand %p998_p0, %p992_p11 }
  0x21   :  { %1002 = shalt.err (!%p999_p1)
}
  0x22   :  { %22 = dma.hbm_to_vmem [thread:$0]  %s1235_s0, 256, %s1083_s15, [#allocation3], %s1055_s24, %s1055_s24, %s1056_s25  }
  0x23   :  { %s1057_s10 = smov [#allocation7]   ;;  %s1003_s14 = scalar_lea.hbm %s1237_s2, 512 }
  0x24   :  { %s40_s11 = sshll.u32 %s1057_s10, 4  ;;  %p1004_p2 = scmp.ne.s32.totalorder %s1237_s2, %s1003_s14  ;;  %s41_s11 = int_to_ptr.vmem [resolvable:$true] %s40_s11 }
  0x25   :  { %p1007_p3 = scmp.lt.u32.totalorder %s1003_s14, %s1237_s2 }
  0x27   :  { %p1009_p4 = pnand %p1007_p3, %p1004_p2 }
  0x29   :  { %1012 = shalt.err (!%p1009_p4)
}
  0x2a   :  { %s1013_s20 = scalar_lea.vmem %s41_s11, 512  ;;  %p1018_p6 = scmp.lt.s32.totalorder %s41_s11, %s41_s11 }
  0x2b   :  { %p1014_p5 = scmp.ne.s32.totalorder %s41_s11, %s1013_s20  ;;  %p1019_p7 = scmp.lt.s32.totalorder %s1013_s20, %s1013_s20 }
  0x2d   :  { %p1020_p8 = por %p1019_p7, %p1018_p6 }
  0x2f   :  { %p1021_p9 = pnand %p1020_p8, %p1014_p5 }
  0x31   :  { %1024 = shalt.err (!%p1021_p9)
}
  0x32   :  { %46 = dma.hbm_to_vmem [thread:$0]  %s1237_s2, 512, %s41_s11, [#allocation6], %s1055_s24, %s1055_s24, %s1056_s25  }
  0x33   :  { %1047 = dma.done.wait [#allocation3], 256  }
  0x34   :  { %1048 = vsyncadd [#allocation3], 4294967040 }
  0x35   :  { %1049 = dma.done.wait [#allocation6], 1536  }
  0x36   :  { %1050 = vsyncadd [#allocation6], 4294965760  ;;  %vm67_vm0 = vcmask 261120   ;;  %v59_v0 = vld [vmem:[#allocation5] sm:$0xff]  ;;  %v60_v1 = vld [vmem:[#allocation5 + $0x8] sm:$0xff]  ;;  %v1058_v14 = vmov 0.0  }
  0x37   :  { %v61_v2 = vld [vmem:[#allocation5 + $0x10] sm:$0xff]  ;;  %v917_v3 = vpack.c.bf16 %v60_v1, %v59_v0  ;;  %v62_v4 = vld [vmem:[#allocation5 + $0x18] sm:$0xff]  ;;  %v63_v7 = vld [vmem:[#allocation5 + $0x20] sm:$0xff]  ;;  %vm1059_vm1 = vmmov 0   ;;  %s1060_s2 = smov 112   ;;  %vm235_vm2 = vcmask 130048  }
  0x38   :  { %v57_v5 = vld [vmem:[#allocation2] sm:$0xff]  ;;  %v921_v6 = vpack.c.bf16 %v62_v4, %v61_v2  ;;  %v64_v8 = vld [vmem:[#allocation5 + $0x28] sm:$0xff]  ;;  %v66_v11 = vld [vmem:[#allocation5 + $0x38] sm:$0xff]  ;;  %vm429_vm3 = vcmask 64512   ;;  %s1061_s21 = smov 96   ;;  %vm483_vm4 = vcmask 1043456  }
  0x39   :  { %843 = vmatprep.mubr.msk.f32.mxu0 %vm67_vm0, %v57_v5  ;;  %v65_v9 = vld [vmem:[#allocation5 + $0x30] sm:$0xff]  ;;  %854 = vmatprep.mubr.msk.f32.mxu1 %vm67_vm0, %v57_v5  ;;  %v925_v10 = vpack.c.bf16 %v64_v8, %v63_v7  ;;  %v58_v13 = vld [vmem:[#allocation2 + $0x8] sm:$0xff]  ;;  %s1062_s22 = smov [#allocation8]  }
  0x3a   :  { %918 = vmatprep.subr.bf16.mxu0 %v917_v3  ;;  %v929_v12 = vpack.c.bf16 %v66_v11, %v65_v9  ;;  %s776_s23 = sshll.u32 %s1062_s22, 4  ;;  %s777_s23 = int_to_ptr.vmem [resolvable:$true] %s776_s23 }
  0x3b   :  { %920 = vmatpush3.bf16.msra.mxu0 %v917_v3  ;;  %926 = vmatprep.subr.bf16.mxu1 %v925_v10  ;;  %s1025_s26 = scalar_lea.vmem %s777_s23, 256  ;;  %p1030_p11 = scmp.lt.s32.totalorder %s777_s23, %s777_s23 }
  0x3c   :  { %922 = vmatprep.subr.bf16.mxu0 %v921_v6  ;;  %928 = vmatpush3.bf16.msra.mxu1 %v925_v10  ;;  %p1026_p10 = scmp.ne.s32.totalorder %s777_s23, %s1025_s26  ;;  %p1031_p12 = scmp.lt.s32.totalorder %s1025_s26, %s1025_s26 }
  0x3d   :  { %930 = vmatprep.subr.bf16.mxu1 %v929_v12 }
  0x3e   :  { %p1032_p13 = por %p1031_p12, %p1030_p11 }
  0x3f   :  { %924 = vmatpush3.bf16.msra.mxu0 %v921_v6 }
  0x40   :  { %932 = vmatpush3.bf16.msra.mxu1 %v929_v12  ;;  %857 = vmatprep.subr.bf16.mxu0 %v1058_v14  ;;  %p1033_p0 = pnand %p1032_p13, %p1026_p10 }
  0x41   :  { %863 = vmatprep.subr.bf16.mxu1 %v1058_v14 }
  0x42   :  { %844 = vmatmul.mubr.msk.f32.vlgmr.msra.gmra.mrb[0].mxu0 %vm67_vm0, %v58_v13 }
  0x43   :  { %855 = vmatmul.mubr.msk.f32.vlgmr.msra.gmra.mrb[0].mxu1 %vm67_vm0, %v58_v13  ;;  %859 = vmatprep.mubr.msk.bf16.mxu0 %vm1059_vm1, %v1058_v14 }
  0x44   :  { %865 = vmatprep.mubr.msk.bf16.mxu1 %vm1059_vm1, %v1058_v14 }
 0x115   :  { %v845_v15 = vpop.f32.mrb[0].mxu0 }
 0x116   :  { %v140_v16 = vpop.f32.mrb[1].mxu0  ;;  %v856_v18 = vpop.f32.mrb[0].mxu1  ;;  %v1147_v21 = vpack.c.bf16 %v845_v15, %v845_v15 }
 0x117   :  { %v228_v17 = vpack.c.bf16 %v140_v16, %v140_v16  ;;  %v215_v19 = vpop.f32.mrb[1].mxu1  ;;  %v1149_v22 = vpack.c.bf16 %v856_v18, %v856_v18 }
 0x118   :  { %v1145_v20 = vpack.c.bf16 %v215_v19, %v215_v19 }
 0x119   :  { %233 = vrot.lane.b32.xlu0 %v228_v17, %s1060_s2 }
 0x11a   :  { %332 = vrot.lane.b32.xlu1 %v1145_v20, %s1060_s2 }
 0x11d   :  { %283 = vrot.lane.b32.xlu0 %v1147_v21, %s1060_s2 }
 0x11e   :  { %381 = vrot.lane.b32.xlu1 %v1149_v22, %s1060_s2 }
 0x18b   :  { %v234_v23 = vpop.permute.xlu0 %233 }
 0x18c   :  { %v240_v24 = vsel %vm235_vm2, %v234_v23, 0  ;;  %v333_v25 = vpop.permute.xlu1 %332 }
 0x18d   :  { %858 = vmatpush3.bf16.xpose.msra.mxu0 %v240_v24  ;;  %v338_v28 = vsel %vm235_vm2, %v333_v25, 0 }
 0x18e   :  { %869 = vmatprep.subr.bf16.mxu0 %v1058_v14 }
 0x18f   :  { %v284_v26 = vpop.permute.xlu0 %283 }
 0x190   :  { %v289_v27 = vsel %vm235_vm2, %v284_v26, 0  ;;  %v382_v29 = vpop.permute.xlu1 %381 }
 0x191   :  { %864 = vmatpush3.bf16.xpose.msra.mxu1 %v289_v27  ;;  %v387_v30 = vsel %vm235_vm2, %v382_v29, 0 }
 0x192   :  { %875 = vmatprep.subr.bf16.mxu1 %v1058_v14 }
 0x194   :  { %860 = vmatmul.mubr.msk.bf16.vlgmr.msra.gmra.mrb[4].mxu0 %vm235_vm2, %v228_v17 }
 0x195   :  { %870 = vmatpush3.bf16.xpose.msra.mxu0 %v338_v28  ;;  %871 = vmatprep.mubr.msk.bf16.mxu0 %vm1059_vm1, %v1058_v14 }
 0x196   :  { %881 = vmatprep.subr.bf16.mxu0 %v1058_v14 }
 0x198   :  { %866 = vmatmul.mubr.msk.bf16.vlgmr.msra.gmra.mrb[4].mxu1 %vm235_vm2, %v1147_v21 }
 0x199   :  { %876 = vmatpush3.bf16.xpose.msra.mxu1 %v387_v30  ;;  %877 = vmatprep.mubr.msk.bf16.mxu1 %vm1059_vm1, %v1058_v14 }
 0x19a   :  { %887 = vmatprep.subr.bf16.mxu1 %v1058_v14 }
 0x19c   :  { %872 = vmatmul.mubr.msk.bf16.vlgmr.msra.gmra.mrb[8].mxu0 %vm235_vm2, %v1145_v20 }
 0x19d   :  { %883 = vmatprep.mubr.msk.bf16.mxu0 %vm1059_vm1, %v1058_v14 }
 0x1a0   :  { %878 = vmatmul.mubr.msk.bf16.vlgmr.msra.gmra.mrb[8].mxu1 %vm235_vm2, %v1149_v22 }
 0x1a1   :  { %889 = vmatprep.mubr.msk.bf16.mxu1 %vm1059_vm1, %v1058_v14 }
 0x267   :  { %v276_v31 = vpop.f32.mrb[4].mxu0 }
 0x268   :  { %v861_v32 = vpop.f32.mrb[5].mxu0  ;;  %v430_v33 = vsel %vm429_vm3, %v276_v31, -inf }
 0x269   :  { %431 = vmax.xlane.f32.xlu0 %v430_v33  ;;  %v279_v34 = vpop.f32.mrb[6].mxu0  ;;  %v224_v32 = vld [vmem:[#allocation7] sm:$0xff]  ;;  %v225_v33 = vld [vmem:[#allocation7 + $0x8] sm:$0xff] }
 0x26a   :  { %v862_v35 = vpop.f32.mrb[7].mxu0  ;;  %v673_v34 = vpack.c.bf16 %v225_v33, %v224_v32 }
 0x26b   :  { %v325_v36 = vpop.f32.mrb[4].mxu1  ;;  %v226_v35 = vld [vmem:[#allocation7 + $0x10] sm:$0xff] }
 0x26c   :  { %v867_v37 = vpop.f32.mrb[5].mxu1  ;;  %v433_v38 = vsel %vm429_vm3, %v325_v36, -inf }
 0x26d   :  { %434 = vmax.xlane.f32.xlu1 %v433_v38  ;;  %v328_v39 = vpop.f32.mrb[6].mxu1 }
 0x26e   :  { %v868_v40 = vpop.f32.mrb[7].mxu1 }
 0x26f   :  { %v374_v41 = vpop.f32.mrb[8].mxu0 }
 0x270   :  { %v873_v42 = vpop.f32.mrb[9].mxu0  ;;  %v436_v43 = vsel %vm429_vm3, %v374_v41, -inf }
 0x271   :  { %437 = vmax.xlane.f32.xlu0 %v436_v43  ;;  %v377_v44 = vpop.f32.mrb[10].mxu0 }
 0x272   :  { %v874_v45 = vpop.f32.mrb[11].mxu0 }
 0x273   :  { %v423_v46 = vpop.f32.mrb[8].mxu1 }
 0x274   :  { %v879_v47 = vpop.f32.mrb[9].mxu1  ;;  %v439_v48 = vsel %vm429_vm3, %v423_v46, -inf }
 0x275   :  { %440 = vmax.xlane.f32.xlu0 %v439_v48  ;;  %v426_v49 = vpop.f32.mrb[10].mxu1 }
 0x276   :  { %v880_v50 = vpop.f32.mrb[11].mxu1 }
 0x27e   :  { %478 = vrot.lane.b32.xlu1 %v228_v17, %s1061_s21 }
 0x2f6   :  { %v432_v51 = vpop.xlane.xlu0 %431 }
 0x2f7   :  { %v442_v52 = vsub.f32 %v276_v31, %v432_v51 }
 0x2f9   :  { %v446_v53 = vmul.f32 1.442695, %v442_v52 }
 0x2fa   :  { %v435_v54 = vpop.xlane.xlu1 %434 }
 0x2fb   :  { %943 = vpow2.f32 %v446_v53  ;;  %v443_v55 = vsub.f32 %v325_v36, %v435_v54  ;;  %v227_v36 = vld [vmem:[#allocation7 + $0x18] sm:$0xff] }
 0x2fc   :  { %v674_v37 = vpack.c.bf16 %v227_v36, %v226_v35 }
 0x2fd   :  { %v448_v56 = vmul.f32 1.442695, %v443_v55 }
 0x2fe   :  { %v479_v57 = vpop.permute.xlu1 %478  ;;  %v438_v58 = vpop.xlane.xlu0 %437 }
 0x2ff   :  { %945 = vpow2.f32 %v448_v56  ;;  %v485_v59 = vsel %vm483_vm4, %v479_v57, 0  ;;  %v444_v5 = vsub.f32 %v374_v41, %v438_v58 }
 0x300   :  { %882 = vmatpush3.bf16.msra.mxu0 %v485_v59 }
 0x301   :  { %893 = vmatprep.subr.bf16.mxu0 %v1058_v14  ;;  %v450_v6 = vmul.f32 1.442695, %v444_v5 }
 0x302   :  { %v441_v60 = vpop.xlane.xlu0 %440 }
 0x303   :  { %v445_v61 = vsub.f32 %v423_v46, %v441_v60 }
 0x305   :  { %v944_v62 = vpop.eup %943  ;;  %v452_v63 = vmul.f32 1.442695, %v445_v61 }
 0x306   :  { %v454_v0 = vsel %vm429_vm3, %v944_v62, 0.0 }
 0x307   :  { %947 = vpow2.f32 %v452_v63  ;;  %455 = vadd.xlane.f32.xlu1 %v454_v0 }
 0x308   :  { %949 = vpow2.f32 %v450_v6 }
 0x309   :  { %v946_v1 = vpop.eup %945 }
 0x30a   :  { %v457_v2 = vsel %vm429_vm3, %v946_v1, 0.0 }
 0x30b   :  { %458 = vadd.xlane.f32.xlu0 %v457_v2 }
 0x311   :  { %v948_v3 = vpop.eup %947 }
 0x312   :  { %v463_v4 = vsel %vm429_vm3, %v948_v3, 0.0  ;;  %v950_v7 = vpop.eup %949 }
 0x313   :  { %464 = vadd.xlane.f32.xlu0 %v463_v4  ;;  %v460_v8 = vsel %vm429_vm3, %v950_v7, 0.0 }
 0x318   :  { %575 = vrot.lane.b32.xlu1 %v1145_v20, %s1061_s21 }
 0x329   :  { %527 = vrot.lane.b32.xlu0 %v1147_v21, %s1061_s21 }
 0x33c   :  { %461 = vadd.xlane.f32.xlu1 %v460_v8 }
 0x34d   :  { %623 = vrot.lane.b32.xlu1 %v1149_v22, %s1061_s21 }
 0x394   :  { %v456_v9 = vpop.xlane.xlu1 %455 }
 0x395   :  { %951 = vrcp.f32 %v456_v9 }
 0x398   :  { %v459_v10 = vpop.xlane.xlu0 %458  ;;  %v576_v15 = vpop.permute.xlu1 %575 }
 0x399   :  { %953 = vrcp.f32 %v459_v10  ;;  %v581_v18 = vsel %vm483_vm4, %v576_v15, 0 }
 0x39f   :  { %v952_v11 = vpop.eup %951 }
 0x3a0   :  { %v470_v12 = vmul.f32 %v952_v11, %v944_v62  ;;  %v465_v13 = vpop.xlane.xlu0 %464 }
 0x3a1   :  { %955 = vrcp.f32 %v465_v13 }
 0x3a2   :  { %v474_v16 = vpack.c.bf16 %v470_v12, %v470_v12 }
 0x3a3   :  { %v954_v17 = vpop.eup %953 }
 0x3a4   :  { %v471_v19 = vmul.f32 %v954_v17, %v946_v1  ;;  %884 = vmatmul.mubr.msk.bf16.vlgmr.msra.gmra.mrb[12].mxu0 %vm429_vm3, %v474_v16  ;;  %v528_v20 = vpop.permute.xlu0 %527 }
 0x3a5   :  { %894 = vmatpush3.bf16.msra.mxu0 %v581_v18  ;;  %v533_v21 = vsel %vm483_vm4, %v528_v20, 0  ;;  %895 = vmatprep.mubr.msk.bf16.mxu0 %vm1059_vm1, %v1058_v14 }
 0x3a6   :  { %888 = vmatpush3.bf16.msra.mxu1 %v533_v21  ;;  %v475_v22 = vpack.c.bf16 %v471_v19, %v471_v19  ;;  %905 = vmatprep.subr.bf16.mxu0 %v1058_v14 }
 0x3a7   :  { %899 = vmatprep.subr.bf16.mxu1 %v1058_v14 }
 0x3a9   :  { %890 = vmatmul.mubr.msk.bf16.vlgmr.msra.gmra.mrb[12].mxu1 %vm429_vm3, %v475_v22 }
 0x3aa   :  { %901 = vmatprep.mubr.msk.bf16.mxu1 %vm1059_vm1, %v1058_v14 }
 0x3ab   :  { %v956_v23 = vpop.eup %955 }
 0x3ac   :  { %v473_v25 = vmul.f32 %v956_v23, %v948_v3 }
 0x3ae   :  { %v477_v28 = vpack.c.bf16 %v473_v25, %v473_v25 }
 0x3c9   :  { %v462_v24 = vpop.xlane.xlu1 %461 }
 0x3ca   :  { %957 = vrcp.f32 %v462_v24 }
 0x3cd   :  { %v624_v26 = vpop.permute.xlu1 %623 }
 0x3ce   :  { %v629_v27 = vsel %vm483_vm4, %v624_v26, 0 }
 0x3cf   :  { %900 = vmatpush3.bf16.msra.mxu1 %v629_v27 }
 0x3d0   :  { %911 = vmatprep.subr.bf16.mxu1 %v1058_v14 }
 0x3d2   :  { %902 = vmatmul.mubr.msk.bf16.vlgmr.msra.gmra.mrb[16].mxu1 %vm429_vm3, %v477_v28 }
 0x3d3   :  { %913 = vmatprep.mubr.msk.bf16.mxu1 %vm1059_vm1, %v1058_v14  ;;  %912 = vmatpush3.bf16.msra.mxu1 %v674_v37 }
 0x3d4   :  { %v958_v29 = vpop.eup %957 }
 0x3d5   :  { %v472_v30 = vmul.f32 %v958_v29, %v950_v7 }
 0x3d7   :  { %v476_v31 = vpack.c.bf16 %v472_v30, %v472_v30 }
 0x3d9   :  { %896 = vmatmul.mubr.msk.bf16.vlgmr.msra.gmra.mrb[16].mxu0 %vm429_vm3, %v476_v31 }
 0x3da   :  { %907 = vmatprep.mubr.msk.bf16.mxu0 %vm1059_vm1, %v1058_v14  ;;  %906 = vmatpush3.bf16.msra.mxu0 %v673_v34 }
 0x477   :  { %v521_v38 = vpop.f32.mrb[12].mxu0 }
 0x478   :  { %v885_v39 = vpop.f32.mrb[13].mxu0 }
 0x479   :  { %v524_v40 = vpop.f32.mrb[14].mxu0 }
 0x47a   :  { %v886_v41 = vpop.f32.mrb[15].mxu0 }
 0x47c   :  { %v569_v42 = vpop.f32.mrb[12].mxu1 }
 0x47d   :  { %v671_v43 = vpack.c.bf16 %v569_v42, %v521_v38  ;;  %v891_v44 = vpop.f32.mrb[13].mxu1 }
 0x47e   :  { %v572_v45 = vpop.f32.mrb[14].mxu1 }
 0x47f   :  { %v892_v46 = vpop.f32.mrb[15].mxu1  ;;  %908 = vmatmul.mubr.msk.bf16.vlgmr.msra.gmra.mrb[20].mxu0 %vm235_vm2, %v671_v43 }
 0x4a5   :  { %v665_v14 = vpop.f32.mrb[16].mxu1 }
 0x4a6   :  { %v903_v47 = vpop.f32.mrb[17].mxu1 }
 0x4a7   :  { %v668_v48 = vpop.f32.mrb[18].mxu1 }
 0x4a8   :  { %v904_v49 = vpop.f32.mrb[19].mxu1 }
 0x4ac   :  { %v617_v50 = vpop.f32.mrb[16].mxu0 }
 0x4ad   :  { %v672_v51 = vpack.c.bf16 %v665_v14, %v617_v50  ;;  %v897_v52 = vpop.f32.mrb[17].mxu0 }
 0x4ae   :  { %v620_v53 = vpop.f32.mrb[18].mxu0 }
 0x4af   :  { %v898_v54 = vpop.f32.mrb[19].mxu0  ;;  %914 = vmatmul.mubr.msk.bf16.vlgmr.msra.gmra.mrb[20].mxu1 %vm235_vm2, %v672_v51 }
 0x552   :  { %v712_v55 = vpop.f32.mrb[20].mxu0 }
 0x553   :  { %v909_v56 = vpop.f32.mrb[21].mxu0  ;;  %v763_v60 = vsel %vm67_vm0, %v712_v55, 0.0 }
 0x554   :  { %v715_v57 = vpop.f32.mrb[22].mxu0 }
 0x555   :  { %v910_v58 = vpop.f32.mrb[23].mxu0  ;;  %v766_v1 = vsel %vm67_vm0, %v715_v57, 0.0 }
 0x582   :  { %v756_v59 = vpop.f32.mrb[20].mxu1 }
 0x583   :  { %v764_v61 = vsel %vm67_vm0, %v756_v59, 0.0  ;;  %v915_v62 = vpop.f32.mrb[21].mxu1 }
 0x584   :  { %v765_v63 = vadd.f32 %v764_v61, %v763_v60  ;;  %v759_v0 = vpop.f32.mrb[22].mxu1 }
 0x585   :  { %v767_v2 = vsel %vm67_vm0, %v759_v0, 0.0  ;;  %v916_v3 = vpop.f32.mrb[23].mxu1 }
 0x586   :  { %769 = vst.msk [vmem:[#allocation8] sm:$0xff] %vm67_vm0, %v765_v63  ;;  %v768_v4 = vadd.f32 %v767_v2, %v766_v1 }
 0x588   :  { %770 = vst.msk [vmem:[#allocation8 + $0x8] sm:$0xff] %vm67_vm0, %v768_v4 }
 0x589   :  { %1036 = shalt.err (!%p1033_p0)
}
 0x58a   :  { %s1037_s29 = scalar_lea.hbm %s1238_s3, 256 }
 0x58b   :  { %p1038_p1 = scmp.ne.s32.totalorder %s1238_s3, %s1037_s29  ;;  %p1041_p2 = scmp.lt.u32.totalorder %s1037_s29, %s1238_s3 }
 0x58d   :  { %p1043_p3 = pnand %p1041_p2, %p1038_p1 }
 0x58f   :  { %1046 = shalt.err (!%p1043_p3)
}
 0x590   :  { %782 = dma.vmem_to_hbm [thread:$0]  %s777_s23, 256, %s1238_s3, [#allocation4], %s1055_s24, %s1055_s24, %s1056_s25  }
 0x591   :  { %1051 = dma.done.wait [#allocation4], 256  }
 0x592   :  { %1052 = vsyncadd [#allocation4], 4294967040 }
 0x593   :  { %786 = vsyncpa [#allocation3], 1 }
 0x594   :  { %787 = vsyncpa [#allocation6], 1 }
 0x595   :  { %788 = vsyncpa [#allocation4], 1 }

</bundles_post_ra>
